<compile_context>
chip_gen: v7x
topology: tpu7x:2x2x1
jax: 0.10.0
libtpu: 0.0.40
codegen_flags: <defaults>
</compile_context>

<pallas_src>
import functools

import jax
import jax.numpy as jnp
from jax.experimental import pallas as pl
from jax.experimental.pallas import tpu as pltpu


def _round_up(x, m):
    return (x + m - 1) // m * m


def _tpu_device_kind():
    try:
        return jax.devices()[0].device_kind
    except Exception:
        return ""


def _vmem_limit_bytes():
    """3/4 of physical VMEM, clamped to [32 MiB, 96 MiB].

    v5e/v6e (128 MiB physical) -> 96 MiB; v7x (64 MiB physical) -> 48 MiB.
    """
    cap = None
    try:
        cap = getattr(pltpu.get_tpu_info(), "vmem_capacity_bytes", None)
    except Exception:
        cap = None
    if not cap:
        cap = 64 * 1024 * 1024  # conservative fallback (= v7x physical)
    return int(min(96 * 1024 * 1024, max(32 * 1024 * 1024, cap * 3 // 4)))


def choose_tiles(batch, in_dim, out_dim, k, *, tb=None, tm=None, td=None,
                 tpu_kind=None):
    """MXU / lane friendly, per-generation tile extents."""
    del k
    kind = (tpu_kind if tpu_kind is not None else _tpu_device_kind()).lower()
    is_v6 = "v6" in kind
    is_v7 = "v7" in kind
    if tb is None:
        tb = 512 if is_v6 else 256      # arithmetic-intensity (weight reuse) knob
    if tm is None:
        tm = 256                        # keep <=256: finalize max-tree stays in vregs
    if td is None:
        td = 2048                       # fewer reduction steps, bigger weight DMAs

    # Never tile larger than the (padded) problem; tiny batches use a small,
    # 16-row-aligned tb instead of padding to 128+ rows of dead MXU work.
    tb = min(tb, max(16, _round_up(batch, 16)))
    tm = min(tm, _round_up(out_dim, 128))
    td = min(td, _round_up(in_dim, 128))

    # v7x has 2 TensorCores sharded over the "parallel" grid axes: make sure
    # there are at least 2 parallel tiles when the problem allows it.
    b_tiles = _round_up(batch, tb) // tb
    m_tiles = _round_up(out_dim, tm) // tm
    if is_v7 and b_tiles * m_tiles < 2 and _round_up(out_dim, 128) >= 256:
        tm = 128
    return tb, tm, td


def pack_maxout_params(w_linear, b_linear, in_dim, out_dim, k, *, tm, td,
                       compute_dtype=jnp.bfloat16):
    """One-time (init-time) packing of nn.Linear(in_dim, k*out_dim) params.

    nn.Linear column c = i*k + j (i over out_dim, j over k, because of the
    .view(batch, out_dim, k)).  We repack so that for output tile `mt`,
    piece `j`, local column `li`, the packed column is
        c_packed = mt*(k*tm) + j*tm + li
    i.e. each piece occupies a contiguous, 128-aligned lane slab inside the
    (td, k*tm) weight block the kernel sees -> one wide matmul + cheap
    slab-wise max.  Runs once at parameter-init time, NOT per forward.
    """
    Dp = _round_up(in_dim, td)
    Mp = _round_up(out_dim, tm)

    # (k*out_dim, in_dim), row = i*k + j  ->  (out_dim, k, in_dim)
    w = w_linear.reshape(out_dim, k, in_dim)
    w = jnp.pad(w, ((0, Mp - out_dim), (0, 0), (0, Dp - in_dim)))
    w = w.reshape(Mp // tm, tm, k, Dp)           # (mt, li, j, d)
    w = jnp.transpose(w, (3, 0, 2, 1))           # (d, mt, j, li)
    w_packed = w.reshape(Dp, (Mp // tm) * k * tm).astype(compute_dtype)

    b = b_linear.reshape(out_dim, k)
    b = jnp.pad(b, ((0, Mp - out_dim), (0, 0)))
    b = b.reshape(Mp // tm, tm, k)               # (mt, li, j)
    b = jnp.transpose(b, (0, 2, 1))              # (mt, j, li)
    b_packed = b.reshape(1, (Mp // tm) * k * tm).astype(jnp.float32)
    return w_packed, b_packed


def maxout_kernel(x_ref, w_ref, b_ref, o_ref, acc_ref, *, k, tm):
    """Multi-step reduction path.
       x_ref: (tb, td)  w_ref: (td, k*tm)  b_ref: (1, k*tm)
       o_ref: (tb, tm)  acc_ref: (tb, k*tm) f32 scratch."""
    di = pl.program_id(2)

    @pl.when(di == 0)
    def _init():
        # Bias folded in at init -> finalize is a pure max tree.
        acc_ref[...] = jnp.broadcast_to(b_ref[...], acc_ref.shape)

    # One wide MXU matmul per step: all k pieces packed into the lane dim.
    acc_ref[...] += jnp.dot(x_ref[...], w_ref[...],
                            preferred_element_type=jnp.float32)

    @pl.when(di == pl.num_programs(2) - 1)
    def _finalize():
        # Running-max fold over 128-aligned lane slabs (static VMEM views).
        r = acc_ref[:, 0:tm]
        for j in range(1, k):
            lo = j * tm
            r = jnp.maximum(r, acc_ref[:, lo:lo + tm])
        o_ref[...] = r.astype(o_ref.dtype)


def maxout_kernel_single_step(x_ref, w_ref, b_ref, o_ref, *, k, tm):
    """Single reduction step (whole in_dim fits in one td tile): no acc
    scratch round trip.  Slab-wise matmuls keep the live values at ~2x(tb,tm)
    f32 instead of one (tb, k*tm) monster."""
    x = x_ref[...]
    r = jnp.dot(x, w_ref[:, 0:tm],
                preferred_element_type=jnp.float32) + b_ref[:, 0:tm]
    for j in range(1, k):
        lo = j * tm
        r = jnp.maximum(
            r,
            jnp.dot(x, w_ref[:, lo:lo + tm],
                    preferred_element_type=jnp.float32) + b_ref[:, lo:lo + tm])
    o_ref[...] = r.astype(o_ref.dtype)


def maxout(x, w_packed, b_packed, out_dim, k, *, tb, tm, td,
           compute_dtype=jnp.bfloat16, out_dtype=None, weight_buffers=None):
    """x: (batch, in_dim); w_packed/b_packed from pack_maxout_params."""
    batch, in_dim = x.shape
    Dp, Gp = w_packed.shape
    Mp = Gp // k
    assert Mp % tm == 0 and Dp % td == 0
    Bp = _round_up(batch, tb)
    out_dtype = out_dtype or x.dtype

    xp = x.astype(compute_dtype)
    if (Bp, Dp) != (batch, in_dim):
        xp = jnp.pad(xp, ((0, Bp - batch), (0, Dp - in_dim)))

    grid = (Bp // tb, Mp // tm, Dp // td)
    b_tiles, m_tiles, d_tiles = grid

    if d_tiles == 1:
        kernel = functools.partial(maxout_kernel_single_step, k=k, tm=tm)
        scratch_shapes = []
    else:
        kernel = functools.partial(maxout_kernel, k=k, tm=tm)
        scratch_shapes = [pltpu.VMEM((tb, k * tm), jnp.float32)]

    # Optional deeper buffering for the dominant (weight) DMA stream.
    w_spec_kwargs = {}
    if weight_buffers is not None and weight_buffers != 2:
        w_spec_kwargs["pipeline_mode"] = pl.Buffered(weight_buffers)
    w_spec = pl.BlockSpec((td, k * tm), lambda bi, mi, di: (di, mi),
                          **w_spec_kwargs)

    # Advisory cost estimate; account for re-streaming across grid tiles.
    cost = pl.CostEstimate(
        flops=2 * Bp * Dp * k * Mp,
        transcendentals=0,
        bytes_accessed=int(
            xp.size * xp.dtype.itemsize * m_tiles
            + w_packed.size * w_packed.dtype.itemsize * b_tiles
            + b_packed.size * b_packed.dtype.itemsize * b_tiles
            + Bp * Mp * jnp.dtype(out_dtype).itemsize),
    )

    out_padded = pl.pallas_call(
        kernel,
        out_shape=jax.ShapeDtypeStruct((Bp, Mp), out_dtype),
        grid_spec=pltpu.PrefetchScalarGridSpec(
            num_scalar_prefetch=0,
            grid=grid,
            in_specs=[
                pl.BlockSpec((tb, td), lambda bi, mi, di: (bi, di)),
                w_spec,
                pl.BlockSpec((1, k * tm), lambda bi, mi, di: (0, mi)),
            ],
            out_specs=pl.BlockSpec((tb, tm), lambda bi, mi, di: (bi, mi)),
            scratch_shapes=scratch_shapes,
        ),
        compiler_params=pltpu.CompilerParams(
            dimension_semantics=("parallel", "parallel", "arbitrary"),
            vmem_limit_bytes=_vmem_limit_bytes(),
        ),
        cost_estimate=cost,
    )(xp, w_packed, b_packed)

    return out_padded[:batch, :out_dim]


if __name__ == "__main__":
    batch, in_dim, out_dim, k = 8, 32, 128, 4

    key = jax.random.PRNGKey(0)
    kx, kw, kb = jax.random.split(key, 3)
    x = jax.random.normal(kx, (batch, in_dim), dtype=jnp.float32)
    # Deterministic synthetic params (same shapes as nn.Linear(in_dim, k*out_dim)).
    bound = 1.0 / (in_dim ** 0.5)
    w_linear = jax.random.uniform(kw, (k * out_dim, in_dim), jnp.float32, -bound, bound)
    b_linear = jax.random.uniform(kb, (k * out_dim,), jnp.float32, -bound, bound)

    tb, tm, td = choose_tiles(batch, in_dim, out_dim, k)
    # Init-time packing (hoisted out of the per-call path).
    w_packed, b_packed = pack_maxout_params(
        w_linear, b_linear, in_dim, out_dim, k, tm=tm, td=td,
        compute_dtype=jnp.bfloat16)

    out = maxout(x, w_packed, b_packed, out_dim, k, tb=tb, tm=tm, td=td,
                 compute_dtype=jnp.bfloat16)
    out = jax.block_until_ready(out)

    # Pure-JAX f32 reference of the PyTorch forward semantics (kernel uses
    # bf16 operands with f32 accumulation -> loose tolerance).
    ref = (x @ w_linear.T + b_linear).reshape(batch, out_dim, k).max(axis=2)
    assert out.shape == (batch, out_dim)
    assert jnp.allclose(out, ref, atol=2e-2, rtol=2e-2), (
        float(jnp.max(jnp.abs(out - ref))))

    print("KERNEL_OK")
</pallas_src>

<mosaic_0001>
module attributes {stable_mosaic.version = 11 : i64} {
  func.func @maxout_kernel_single_step(%arg0: i32, %arg1: i32, %arg2: i32, %arg3: memref<16x128xbf16, #tpu.memory_space<vmem>>, %arg4: memref<128x512xbf16, #tpu.memory_space<vmem>>, %arg5: memref<1x512xf32, #tpu.memory_space<vmem>>, %arg6: memref<16x128xf32, #tpu.memory_space<vmem>>) attributes {dimension_semantics = [#tpu.dimension_semantics<parallel>, #tpu.dimension_semantics<parallel>, #tpu.dimension_semantics<arbitrary>], iteration_bounds = array<i64: 1, 1, 1>, scalar_prefetch = 0 : i64, scratch_operands = 0 : i64, tpu.core_type = #tpu.core_type<tc>, window_params = [{transform_indices = @transform_0, window_bounds = array<i64: 16, 128>}, {transform_indices = @transform_1, window_bounds = array<i64: 128, 512>}, {transform_indices = @transform_2, window_bounds = array<i64: 1, 512>}, {transform_indices = @transform_3, window_bounds = array<i64: 16, 128>}]} {
    %c0 = arith.constant 0 : index
    %c0_0 = arith.constant 0 : index
    %0 = vector.load %arg3[%c0, %c0_0] : memref<16x128xbf16, #tpu.memory_space<vmem>>, vector<16x128xbf16>
    %c0_1 = arith.constant 0 : index
    %c0_2 = arith.constant 0 : index
    %1 = vector.load %arg4[%c0_1, %c0_2] : memref<128x512xbf16, #tpu.memory_space<vmem>>, vector<128x128xbf16>
    %cst = arith.constant dense<0.000000e+00> : vector<16x128xf32>
    %2 = tpu.matmul %0, %1, %cst {dimension_numbers = #tpu.dot_dimension_numbers<[1], [0], [0], [1], [0, 0, 1, 1], [], []>} : vector<16x128xbf16>, vector<128x128xbf16>, vector<16x128xf32> -> vector<16x128xf32>
    %c0_3 = arith.constant 0 : index
    %c0_4 = arith.constant 0 : index
    %3 = vector.load %arg5[%c0_3, %c0_4] : memref<1x512xf32, #tpu.memory_space<vmem>>, vector<1x128xf32>
    %4 = vector.broadcast %3 : vector<1x128xf32> to vector<16x128xf32>
    %5 = arith.addf %2, %4 : vector<16x128xf32>
    %c0_5 = arith.constant 0 : index
    %c128 = arith.constant 128 : index
    %6 = vector.load %arg4[%c0_5, %c128] : memref<128x512xbf16, #tpu.memory_space<vmem>>, vector<128x128xbf16>
    %cst_6 = arith.constant dense<0.000000e+00> : vector<16x128xf32>
    %7 = tpu.matmul %0, %6, %cst_6 {dimension_numbers = #tpu.dot_dimension_numbers<[1], [0], [0], [1], [0, 0, 1, 1], [], []>} : vector<16x128xbf16>, vector<128x128xbf16>, vector<16x128xf32> -> vector<16x128xf32>
    %c0_7 = arith.constant 0 : index
    %c128_8 = arith.constant 128 : index
    %8 = vector.load %arg5[%c0_7, %c128_8] : memref<1x512xf32, #tpu.memory_space<vmem>>, vector<1x128xf32>
    %9 = vector.broadcast %8 : vector<1x128xf32> to vector<16x128xf32>
    %10 = arith.addf %7, %9 : vector<16x128xf32>
    %11 = arith.maximumf %5, %10 : vector<16x128xf32>
    %c0_9 = arith.constant 0 : index
    %c256 = arith.constant 256 : index
    %12 = vector.load %arg4[%c0_9, %c256] : memref<128x512xbf16, #tpu.memory_space<vmem>>, vector<128x128xbf16>
    %cst_10 = arith.constant dense<0.000000e+00> : vector<16x128xf32>
    %13 = tpu.matmul %0, %12, %cst_10 {dimension_numbers = #tpu.dot_dimension_numbers<[1], [0], [0], [1], [0, 0, 1, 1], [], []>} : vector<16x128xbf16>, vector<128x128xbf16>, vector<16x128xf32> -> vector<16x128xf32>
    %c0_11 = arith.constant 0 : index
    %c256_12 = arith.constant 256 : index
    %14 = vector.load %arg5[%c0_11, %c256_12] : memref<1x512xf32, #tpu.memory_space<vmem>>, vector<1x128xf32>
    %15 = vector.broadcast %14 : vector<1x128xf32> to vector<16x128xf32>
    %16 = arith.addf %13, %15 : vector<16x128xf32>
    %17 = arith.maximumf %11, %16 : vector<16x128xf32>
    %c0_13 = arith.constant 0 : index
    %c384 = arith.constant 384 : index
    %18 = vector.load %arg4[%c0_13, %c384] : memref<128x512xbf16, #tpu.memory_space<vmem>>, vector<128x128xbf16>
    %cst_14 = arith.constant dense<0.000000e+00> : vector<16x128xf32>
    %19 = tpu.matmul %0, %18, %cst_14 {dimension_numbers = #tpu.dot_dimension_numbers<[1], [0], [0], [1], [0, 0, 1, 1], [], []>} : vector<16x128xbf16>, vector<128x128xbf16>, vector<16x128xf32> -> vector<16x128xf32>
    %c0_15 = arith.constant 0 : index
    %c384_16 = arith.constant 384 : index
    %20 = vector.load %arg5[%c0_15, %c384_16] : memref<1x512xf32, #tpu.memory_space<vmem>>, vector<1x128xf32>
    %21 = vector.broadcast %20 : vector<1x128xf32> to vector<16x128xf32>
    %22 = arith.addf %19, %21 : vector<16x128xf32>
    %23 = arith.maximumf %17, %22 : vector<16x128xf32>
    %c0_17 = arith.constant 0 : index
    %c0_18 = arith.constant 0 : index
    %24 = vector.load %arg6[%c0_17, %c0_18] : memref<16x128xf32, #tpu.memory_space<vmem>>, vector<16x128xf32>
    tpu.vector_store %arg6[%c0_17, %c0_18], %23 {strides = array<i32>} : memref<16x128xf32, #tpu.memory_space<vmem>>, vector<16x128xf32>,
    return
  }
  func.func @transform_0(%arg0: i32, %arg1: i32, %arg2: i32) -> (i32, i32) {
    %c0_i32 = arith.constant 0 : i32
    return %arg0, %arg2 : i32, i32
  }
  func.func @transform_1(%arg0: i32, %arg1: i32, %arg2: i32) -> (i32, i32) {
    %c0_i32 = arith.constant 0 : i32
    return %arg2, %arg1 : i32, i32
  }
  func.func @transform_2(%arg0: i32, %arg1: i32, %arg2: i32) -> (i32, i32) {
    %c0_i32 = arith.constant 0 : i32
    %c0_i32_0 = arith.constant 0 : i32
    return %c0_i32, %arg1 : i32, i32
  }
  func.func @transform_3(%arg0: i32, %arg1: i32, %arg2: i32) -> (i32, i32) {
    %c0_i32 = arith.constant 0 : i32
    return %arg0, %arg1 : i32, i32
  }
}

</mosaic_0001>

<bundles_post_ra>
// kernel: tpu_custom_call.1
= control target key start
LH: loop header
LB: loop body
LE: loop exit
PB: predicated region body
PF: predicated region fallthrough
CT: control target
= control target key end

     0   :  { %8 = vsyncpa [#allocation3], 0  ;;  %s914_s0 = inlined_call_operand.hbm [shape: bf16[16,128], index: 0, kind: input, shape index: {}]   ;;  %s915_s1 = inlined_call_operand.hbm [shape: bf16[128,512], index: 1, kind: input, shape index: {}]   ;;  %s916_s2 = inlined_call_operand.vmem [shape: f32[1,512], index: 2, kind: input, shape index: {}]   ;;  %s917_s3 = inlined_call_operand.hbm [shape: f32[16,128], index: 3, kind: output, shape index: {}]  }
   0x1   :  { %9 = vsyncpa [#allocation6], 0 }
   0x2   :  { %10 = vsyncpa [#allocation4], 0  ;;  %s795_s12 = smov [#allocation2]   ;;  %s723_s16 = scalar_lea.hbm %s914_s0, 128 }
   0x3   :  { %s16_s13 = sshll.u32 %s795_s12, 4  ;;  %p724_p0 = scmp.ne.s32.totalorder %s914_s0, %s723_s16  ;;  %s17_s13 = int_to_ptr.vmem [resolvable:$true] %s16_s13 }
   0x4   :  { %p727_p1 = scmp.lt.u32.totalorder %s723_s16, %s914_s0 }
   0x6   :  { %p729_p2 = pnand %p727_p1, %p724_p0 }
   0x8   :  { %732 = shalt.err (!%p729_p2)
}
   0x9   :  { %s733_s21 = scalar_lea.vmem %s17_s13, 128  ;;  %p738_p4 = scmp.lt.s32.totalorder %s17_s13, %s17_s13 }
   0xa   :  { %p734_p3 = scmp.ne.s32.totalorder %s17_s13, %s733_s21  ;;  %p739_p5 = scmp.lt.s32.totalorder %s733_s21, %s733_s21 }
   0xc   :  { %p740_p6 = por %p739_p5, %p738_p4 }
   0xe   :  { %p741_p7 = pnand %p740_p6, %p734_p3 }
  0x10   :  { %744 = shalt.err (!%p741_p7)
}
  0x11   :  { %s796_s22 = smov 64   ;;  %s797_s23 = smov 4  }
  0x12   :  { %22 = dma.hbm_to_vmem [thread:$0]  %s914_s0, 128, %s17_s13, [#allocation3], %s796_s22, %s796_s22, %s797_s23  }
  0x13   :  { %s798_s26 = smov [#allocation5]   ;;  %s745_s30 = scalar_lea.hbm %s915_s1, 4096 }
  0x14   :  { %s28_s27 = sshll.u32 %s798_s26, 4  ;;  %p746_p8 = scmp.ne.s32.totalorder %s915_s1, %s745_s30  ;;  %s29_s27 = int_to_ptr.vmem [resolvable:$true] %s28_s27 }
  0x15   :  { %p749_p9 = scmp.lt.u32.totalorder %s745_s30, %s915_s1 }
  0x17   :  { %p751_p10 = pnand %p749_p9, %p746_p8 }
  0x19   :  { %754 = shalt.err (!%p751_p10)
}
  0x1a   :  { %s755_s8 = scalar_lea.vmem %s29_s27, 4096  ;;  %p760_p12 = scmp.lt.s32.totalorder %s29_s27, %s29_s27 }
  0x1b   :  { %p756_p11 = scmp.ne.s32.totalorder %s29_s27, %s755_s8  ;;  %p761_p13 = scmp.lt.s32.totalorder %s755_s8, %s755_s8 }
  0x1d   :  { %p762_p0 = por %p761_p13, %p760_p12 }
  0x1f   :  { %p763_p1 = pnand %p762_p0, %p756_p11 }
  0x21   :  { %766 = shalt.err (!%p763_p1)
}
  0x22   :  { %s799_s0 = smov 256   ;;  %s800_s9 = smov 16  }
  0x23   :  { %34 = dma.hbm_to_vmem [thread:$0]  %s915_s1, 4096, %s29_s27, [#allocation6], %s799_s0, %s799_s0, %s800_s9  }
  0x24   :  { %789 = dma.done.wait [#allocation3], 128  }
  0x25   :  { %790 = vsyncadd [#allocation3], 4294967168 }
  0x26   :  { %791 = dma.done.wait [#allocation6], 4096  }
  0x27   :  { %792 = vsyncadd [#allocation6], 4294963200  ;;  %v801_v0 = vmov 0.0   ;;  %vm802_vm0 = vmmov 0   ;;  %v690_v1 = vld [vmem:[#allocation5] ss:$16 sps:$4 sm:$0xff]  }
  0x28   :  { %599 = vmatprep.subr.bf16.mxu0 %v801_v0  ;;  %619 = vmatprep.subr.bf16.mxu1 %v801_v0  ;;  %v691_v2 = vld [vmem:[#allocation5 + $0x4] ss:$16 sps:$4 sm:$0xff]   ;;  %v692_v3 = vld [vmem:[#allocation5 + $0x20] ss:$16 sps:$4 sm:$0xff]   ;;  %v706_v17 = vld [vmem:[#allocation2] sm:$0xff]   ;;  %s803_s19 = smov [#allocation7]  }
  0x29   :  { %615 = vmatprep.mubr.msk.bf16.mxu0 %vm802_vm0, %v801_v0  ;;  %635 = vmatprep.mubr.msk.bf16.mxu1 %vm802_vm0, %v801_v0  ;;  %v693_v4 = vld [vmem:[#allocation5 + $0x24] ss:$16 sps:$4 sm:$0xff]   ;;  %v694_v5 = vld [vmem:[#allocation5 + $0x40] ss:$16 sps:$4 sm:$0xff]   ;;  %v707_v18 = vld [vmem:[#allocation5 + $0x8] ss:$16 sps:$4 sm:$0xff]  }
  0x2a   :  { %600 = vmatpush3.bf16.msra.mxu0 %v690_v1  ;;  %620 = vmatpush3.bf16.msra.mxu1 %v691_v2  ;;  %v695_v6 = vld [vmem:[#allocation5 + $0x44] ss:$16 sps:$4 sm:$0xff]   ;;  %v696_v7 = vld [vmem:[#allocation5 + $0x60] ss:$16 sps:$4 sm:$0xff]   ;;  %v708_v19 = vld [vmem:[#allocation5 + $0xc] ss:$16 sps:$4 sm:$0xff]  }
  0x2b   :  { %601 = vmatprep.subr.bf16.mxu0 %v801_v0  ;;  %621 = vmatprep.subr.bf16.mxu1 %v801_v0  ;;  %v697_v8 = vld [vmem:[#allocation5 + $0x64] ss:$16 sps:$4 sm:$0xff]   ;;  %v698_v9 = vld [vmem:[#allocation5 + $0x80] ss:$16 sps:$4 sm:$0xff]   ;;  %v709_v20 = vld [vmem:[#allocation5 + $0x28] ss:$16 sps:$4 sm:$0xff]  }
  0x2c   :  { %v699_v10 = vld [vmem:[#allocation5 + $0x84] ss:$16 sps:$4 sm:$0xff]   ;;  %v700_v11 = vld [vmem:[#allocation5 + $0xa0] ss:$16 sps:$4 sm:$0xff]   ;;  %v710_v21 = vld [vmem:[#allocation5 + $0x2c] ss:$16 sps:$4 sm:$0xff]  }
  0x2d   :  { %v701_v12 = vld [vmem:[#allocation5 + $0xa4] ss:$16 sps:$4 sm:$0xff]   ;;  %v702_v13 = vld [vmem:[#allocation5 + $0xc0] ss:$16 sps:$4 sm:$0xff]   ;;  %v711_v22 = vld [vmem:[#allocation5 + $0x48] ss:$16 sps:$4 sm:$0xff]  }
  0x2e   :  { %602 = vmatpush3.bf16.msra.mxu0 %v692_v3  ;;  %622 = vmatpush3.bf16.msra.mxu1 %v693_v4  ;;  %v703_v14 = vld [vmem:[#allocation5 + $0xc4] ss:$16 sps:$4 sm:$0xff]   ;;  %v704_v15 = vld [vmem:[#allocation5 + $0xe0] ss:$16 sps:$4 sm:$0xff]   ;;  %v712_v23 = vld [vmem:[#allocation5 + $0x4c] ss:$16 sps:$4 sm:$0xff]  }
  0x2f   :  { %603 = vmatprep.subr.bf16.mxu0 %v801_v0  ;;  %623 = vmatprep.subr.bf16.mxu1 %v801_v0  ;;  %v705_v16 = vld [vmem:[#allocation5 + $0xe4] ss:$16 sps:$4 sm:$0xff]   ;;  %v713_v24 = vld [vmem:[#allocation5 + $0x68] ss:$16 sps:$4 sm:$0xff]   ;;  %v714_v25 = vld [vmem:[#allocation5 + $0x6c] ss:$16 sps:$4 sm:$0xff]  }
  0x30   :  { %v715_v26 = vld [vmem:[#allocation5 + $0x88] ss:$16 sps:$4 sm:$0xff]   ;;  %v716_v27 = vld [vmem:[#allocation5 + $0x8c] ss:$16 sps:$4 sm:$0xff]   ;;  %s513_s20 = sshll.u32 %s803_s19, 4  ;;  %s514_s20 = int_to_ptr.vmem [resolvable:$true] %s513_s20 }
  0x31   :  { %v717_v28 = vld [vmem:[#allocation5 + $0xa8] ss:$16 sps:$4 sm:$0xff]   ;;  %v718_v29 = vld [vmem:[#allocation5 + $0xac] ss:$16 sps:$4 sm:$0xff]   ;;  %p772_p3 = scmp.lt.s32.totalorder %s514_s20, %s514_s20 }
  0x32   :  { %604 = vmatpush3.bf16.msra.mxu0 %v694_v5  ;;  %624 = vmatpush3.bf16.msra.mxu1 %v695_v6  ;;  %v719_v30 = vld [vmem:[#allocation5 + $0xc8] ss:$16 sps:$4 sm:$0xff]   ;;  %v720_v31 = vld [vmem:[#allocation5 + $0xcc] ss:$16 sps:$4 sm:$0xff]  }
  0x33   :  { %605 = vmatprep.subr.bf16.mxu0 %v801_v0  ;;  %625 = vmatprep.subr.bf16.mxu1 %v801_v0  ;;  %v721_v32 = vld [vmem:[#allocation5 + $0xe8] ss:$16 sps:$4 sm:$0xff]   ;;  %v722_v33 = vld [vmem:[#allocation5 + $0xec] ss:$16 sps:$4 sm:$0xff]  }
  0x34   :  { %v526_v34 = vld [vmem:[%s916_s2] ss:$0 sm:$0xff]  ;;  %v536_v35 = vld [vmem:[%s916_s2 + $0x1] ss:$0 sm:$0xff]  ;;  %v545_v50 = vld [vmem:[%s916_s2 + $0x2] ss:$0 sm:$0xff] }
  0x35   :  { %v554_v51 = vld [vmem:[%s916_s2 + $0x3] ss:$0 sm:$0xff]  ;;  %s767_s2 = scalar_lea.vmem %s514_s20, 256 }
  0x36   :  { %606 = vmatpush3.bf16.msra.mxu0 %v696_v7  ;;  %626 = vmatpush3.bf16.msra.mxu1 %v697_v8  ;;  %p768_p2 = scmp.ne.s32.totalorder %s514_s20, %s767_s2  ;;  %p773_p4 = scmp.lt.s32.totalorder %s767_s2, %s767_s2 }
  0x37   :  { %607 = vmatprep.subr.bf16.mxu0 %v801_v0  ;;  %627 = vmatprep.subr.bf16.mxu1 %v801_v0 }
  0x38   :  { %p774_p5 = por %p773_p4, %p772_p3 }
  0x3a   :  { %608 = vmatpush3.bf16.msra.mxu0 %v698_v9  ;;  %628 = vmatpush3.bf16.msra.mxu1 %v699_v10  ;;  %p775_p6 = pnand %p774_p5, %p768_p2 }
  0x3b   :  { %609 = vmatprep.subr.bf16.mxu0 %v801_v0  ;;  %629 = vmatprep.subr.bf16.mxu1 %v801_v0 }
  0x3e   :  { %610 = vmatpush3.bf16.msra.mxu0 %v700_v11  ;;  %630 = vmatpush3.bf16.msra.mxu1 %v701_v12 }
  0x3f   :  { %611 = vmatprep.subr.bf16.mxu0 %v801_v0  ;;  %631 = vmatprep.subr.bf16.mxu1 %v801_v0 }
  0x42   :  { %612 = vmatpush3.bf16.msra.mxu0 %v702_v13  ;;  %632 = vmatpush3.bf16.msra.mxu1 %v703_v14 }
  0x43   :  { %613 = vmatprep.subr.bf16.mxu0 %v801_v0  ;;  %633 = vmatprep.subr.bf16.mxu1 %v801_v0 }
  0x46   :  { %614 = vmatpush3.bf16.msra.mxu0 %v704_v15  ;;  %634 = vmatpush3.bf16.msra.mxu1 %v705_v16 }
  0x47   :  { %639 = vmatprep.subr.bf16.mxu0 %v801_v0  ;;  %659 = vmatprep.subr.bf16.mxu1 %v801_v0 }
  0x49   :  { %616 = vmatmul.mubr.bf16.vlgmr.msra.gmra.mrb[0].mxu0 %v706_v17  ;;  %636 = vmatmul.mubr.bf16.vlgmr.msra.gmra.mrb[0].mxu1 %v706_v17 }
  0x4a   :  { %640 = vmatpush3.bf16.msra.mxu0 %v707_v18  ;;  %660 = vmatpush3.bf16.msra.mxu1 %v708_v19 }
  0x4b   :  { %641 = vmatprep.subr.bf16.mxu0 %v801_v0  ;;  %661 = vmatprep.subr.bf16.mxu1 %v801_v0 }
  0x4c   :  { %655 = vmatprep.mubr.msk.bf16.mxu0 %vm802_vm0, %v801_v0  ;;  %675 = vmatprep.mubr.msk.bf16.mxu1 %vm802_vm0, %v801_v0 }
  0x4e   :  { %642 = vmatpush3.bf16.msra.mxu0 %v709_v20  ;;  %662 = vmatpush3.bf16.msra.mxu1 %v710_v21 }
  0x4f   :  { %643 = vmatprep.subr.bf16.mxu0 %v801_v0  ;;  %663 = vmatprep.subr.bf16.mxu1 %v801_v0 }
  0x52   :  { %644 = vmatpush3.bf16.msra.mxu0 %v711_v22  ;;  %664 = vmatpush3.bf16.msra.mxu1 %v712_v23 }
  0x53   :  { %645 = vmatprep.subr.bf16.mxu0 %v801_v0  ;;  %665 = vmatprep.subr.bf16.mxu1 %v801_v0 }
  0x56   :  { %646 = vmatpush3.bf16.msra.mxu0 %v713_v24  ;;  %666 = vmatpush3.bf16.msra.mxu1 %v714_v25 }
  0x57   :  { %647 = vmatprep.subr.bf16.mxu0 %v801_v0  ;;  %667 = vmatprep.subr.bf16.mxu1 %v801_v0 }
  0x5a   :  { %648 = vmatpush3.bf16.msra.mxu0 %v715_v26  ;;  %668 = vmatpush3.bf16.msra.mxu1 %v716_v27 }
  0x5b   :  { %649 = vmatprep.subr.bf16.mxu0 %v801_v0  ;;  %669 = vmatprep.subr.bf16.mxu1 %v801_v0 }
  0x5e   :  { %650 = vmatpush3.bf16.msra.mxu0 %v717_v28  ;;  %670 = vmatpush3.bf16.msra.mxu1 %v718_v29 }
  0x5f   :  { %651 = vmatprep.subr.bf16.mxu0 %v801_v0  ;;  %671 = vmatprep.subr.bf16.mxu1 %v801_v0 }
  0x62   :  { %652 = vmatpush3.bf16.msra.mxu0 %v719_v30  ;;  %672 = vmatpush3.bf16.msra.mxu1 %v720_v31 }
  0x63   :  { %653 = vmatprep.subr.bf16.mxu0 %v801_v0  ;;  %673 = vmatprep.subr.bf16.mxu1 %v801_v0 }
  0x66   :  { %654 = vmatpush3.bf16.msra.mxu0 %v721_v32  ;;  %674 = vmatpush3.bf16.msra.mxu1 %v722_v33 }
  0x69   :  { %656 = vmatmul.mubr.bf16.vlgmr.msra.gmra.mrb[4].mxu0 %v706_v17  ;;  %676 = vmatmul.mubr.bf16.vlgmr.msra.gmra.mrb[4].mxu1 %v706_v17 }
 0x11c   :  { %v157_v36 = vpop.f32.mrb[0].mxu0  ;;  %v269_v38 = vpop.f32.mrb[0].mxu1 }
 0x11d   :  { %v158_v37 = vadd.f32 %v526_v34, %v157_v36  ;;  %v617_v39 = vpop.f32.mrb[1].mxu0  ;;  %v270_v40 = vadd.f32 %v536_v35, %v269_v38  ;;  %v637_v41 = vpop.f32.mrb[1].mxu1 }
 0x11e   :  { %v160_v42 = vpop.f32.mrb[2].mxu0  ;;  %v272_v44 = vpop.f32.mrb[2].mxu1 }
 0x11f   :  { %v161_v43 = vadd.f32 %v526_v34, %v160_v42  ;;  %v618_v45 = vpop.f32.mrb[3].mxu0  ;;  %v276_v46 = vmax.f32 %v158_v37, %v270_v40  ;;  %v273_v47 = vadd.f32 %v536_v35, %v272_v44  ;;  %v638_v48 = vpop.f32.mrb[3].mxu1 }
 0x121   :  { %v277_v49 = vmax.f32 %v161_v43, %v273_v47 }
 0x13c   :  { %v383_v52 = vpop.f32.mrb[4].mxu0  ;;  %v497_v54 = vpop.f32.mrb[4].mxu1 }
 0x13d   :  { %v384_v53 = vadd.f32 %v545_v50, %v383_v52  ;;  %v657_v55 = vpop.f32.mrb[5].mxu0  ;;  %v498_v56 = vadd.f32 %v554_v51, %v497_v54  ;;  %v677_v57 = vpop.f32.mrb[5].mxu1 }
 0x13e   :  { %v386_v58 = vpop.f32.mrb[6].mxu0  ;;  %v500_v61 = vpop.f32.mrb[6].mxu1 }
 0x13f   :  { %v390_v59 = vmax.f32 %v276_v46, %v384_v53  ;;  %v387_v60 = vadd.f32 %v545_v50, %v386_v58  ;;  %v658_v62 = vpop.f32.mrb[7].mxu0  ;;  %v678_v63 = vpop.f32.mrb[7].mxu1  ;;  %v501_v2 = vadd.f32 %v554_v51, %v500_v61 }
 0x141   :  { %v504_v0 = vmax.f32 %v390_v59, %v498_v56  ;;  %v391_v1 = vmax.f32 %v277_v49, %v387_v60 }
 0x143   :  { %506 = vst [vmem:[#allocation7] sm:$0xff] %v504_v0  ;;  %v505_v3 = vmax.f32 %v391_v1, %v501_v2 }
 0x145   :  { %507 = vst [vmem:[#allocation7 + $0x8] sm:$0xff] %v505_v3 }
 0x146   :  { %778 = shalt.err (!%p775_p6)
}
 0x147   :  { %s779_s23 = scalar_lea.hbm %s917_s3, 256 }
 0x148   :  { %p780_p7 = scmp.ne.s32.totalorder %s917_s3, %s779_s23  ;;  %p783_p8 = scmp.lt.u32.totalorder %s779_s23, %s917_s3 }
 0x14a   :  { %p785_p9 = pnand %p783_p8, %p780_p7 }
 0x14c   :  { %788 = shalt.err (!%p785_p9)
}
 0x14d   :  { %s804_s28 = smov 128   ;;  %s805_s29 = smov 8  }
 0x14e   :  { %519 = dma.vmem_to_hbm [thread:$0]  %s514_s20, 256, %s917_s3, [#allocation4], %s804_s28, %s804_s28, %s805_s29  }
 0x14f   :  { %793 = dma.done.wait [#allocation4], 256  }
 0x150   :  { %794 = vsyncadd [#allocation4], 4294967040 }
 0x151   :  { %523 = vsyncpa [#allocation3], 1 }
 0x152   :  { %524 = vsyncpa [#allocation6], 1 }
 0x153   :  { %525 = vsyncpa [#allocation4], 1 }

</bundles_post_ra>
